<compile_context>
chip_gen: v7x
topology: tpu7x:2x2x1
jax: 0.10.0
libtpu: 0.0.40
codegen_flags: <defaults>
</compile_context>

<pallas_src>
import jax
import jax.numpy as jnp
from jax.experimental import pallas as pl
from jax.experimental.pallas import tpu as pltpu


def _scale_kernel(scale_ref, x_ref, o_ref):
    # scale_ref: (1,) f32 scalar, prefetched into SMEM.
    # f32 multiply keeps full precision of base**lambda for bf16 inputs; the
    # kernel is pure HBM streaming so the upcast of the tile is free.
    o_ref[...] = (x_ref[...].astype(jnp.float32) * scale_ref[0]).astype(o_ref.dtype)


_TARGET_TILE_BYTES = 4 << 20  # ~4 MiB input tile; x2 (dbl-buf) x2 (in+out) ~= 16 MiB VMEM


def lambda_layer(x, lam, base=1, *, tile_bytes=_TARGET_TILE_BYTES):
    """Pallas implementation of LambdaLayer.forward.

    x          : array (any shape, e.g. NCHW)
    lam        : learnable lambda parameter, shape (1,) or scalar
    base       : python int/float (static), matches the module's `base`
    tile_bytes : input-tile size target (exposed so tests can force the
                 multi-tile kernel path at small shapes)
    """
    orig_shape = x.shape
    orig_dtype = x.dtype
    n_elem = x.size

    # Learnable scalar -> effective scale (base ** lambda when base != 1).
    lam = jnp.asarray(lam, jnp.float32).reshape((1,))
    scale = lam if base == 1 else jnp.power(jnp.float32(base), lam)

    # Integer inputs: plain JAX with torch-like promotion (int * f32 -> f32).
    if not jnp.issubdtype(orig_dtype, jnp.floating):
        return x * scale[0]

    def _plain(v):
        # Fused XLA elementwise scale: already at the HBM roofline (1R + 1W).
        return (v.astype(jnp.float32) * scale[0]).astype(orig_dtype)

    itemsize = jnp.dtype(orig_dtype).itemsize
    # Dtype-aware minimum sublane tile (8 for 4B, 16 for 2B, 32 for 1B dtypes).
    sublane = {4: 8, 2: 16, 1: 32}.get(itemsize, 8)

    # Zero-copy lane-dense 2-D view; prefer wide lanes (fewer, longer DMAs).
    lane = next((c for c in (1024, 512, 256, 128) if n_elem % c == 0), None)
    if lane is None:
        # Ragged numel: pad/unpad would ~3x HBM traffic, so use the fused
        # XLA multiply instead (optimal traffic, no extra copies).
        return _plain(x)

    rows = n_elem // lane
    target_rows = max(sublane, (tile_bytes // (lane * itemsize)) // sublane * sublane)

    # Small-tensor / single-tile bypass: no pipelining to gain, and skipping
    # the custom call lets XLA fuse the scale into neighbouring ops.
    if rows <= target_rows:
        return _plain(x)

    # Prefer a tile height that divides `rows` (no masked store on the edge
    # block, balanced split across v7x's 2 TCs) when one exists within ~2x.
    tile_r = target_rows
    for cand in range(target_rows, max(sublane, target_rows // 2) - 1, -sublane):
        if rows % cand == 0:
            tile_r = cand
            break
    num_tiles = pl.cdiv(rows, tile_r)  # >= 2 here (bypass handled single-tile case)

    x2d = jnp.reshape(x, (rows, lane))

    # 2 buffers x (in + out) x tile, plus headroom.  Explicit so v5e's 16 MiB
    # scoped default does not shrink pipelining; stays well under v7x's 64 MiB.
    tile_in_bytes = tile_r * lane * itemsize
    vmem_limit = 4 * tile_in_bytes + (4 << 20)

    out2d = pl.pallas_call(
        _scale_kernel,
        out_shape=jax.ShapeDtypeStruct((rows, lane), orig_dtype),
        grid_spec=pltpu.PrefetchScalarGridSpec(
            num_scalar_prefetch=1,  # `scale` lands in SMEM, passed to index_maps
            grid=(num_tiles,),
            in_specs=[pl.BlockSpec((tile_r, lane), lambda i, s_ref: (i, 0))],
            out_specs=pl.BlockSpec((tile_r, lane), lambda i, s_ref: (i, 0)),
        ),
        compiler_params=pltpu.CompilerParams(
            # Row tiles are independent: shard across v7x's 2 TensorCores
            # (no-op on single-TC v5e/v6e).
            dimension_semantics=("parallel",),
            vmem_limit_bytes=vmem_limit,
        ),
    )(scale, x2d)

    return jnp.reshape(out2d, orig_shape)


if __name__ == "__main__":
    key = jax.random.PRNGKey(0)
    k1, k2, k3 = jax.random.split(key, 3)

    # --- 1) Small NCHW, base == 1 (small-tensor bypass path) --------------
    lam = jnp.array([1.0], dtype=jnp.float32)  # init_lambda = 1
    x = jax.random.normal(k1, (2, 4, 16, 16), dtype=jnp.float32)
    out = jax.block_until_ready(lambda_layer(x, lam, base=1))
    ref = x * lam[0]
    assert out.shape == x.shape and out.dtype == x.dtype
    assert jnp.allclose(out, ref, atol=1e-6, rtol=1e-6)

    # --- 2) Ragged numel, base != 1 (plain-JAX fallback path) -------------
    lam2 = jnp.array([0.5], dtype=jnp.float32)
    x2 = jax.random.normal(k2, (2, 3, 5, 7), dtype=jnp.float32)
    out2 = jax.block_until_ready(lambda_layer(x2, lam2, base=2))
    ref2 = x2 * (jnp.float32(2.0) ** lam2[0])
    assert out2.shape == x2.shape and out2.dtype == x2.dtype
    assert jnp.allclose(out2, ref2, atol=1e-6, rtol=1e-6)

    # --- 3) Pallas kernel path: small shape, shrunk tile -> 2-tile grid ----
    lam3 = jnp.array([0.75], dtype=jnp.float32)
    x3 = jax.random.normal(k3, (2, 4, 64, 64), dtype=jnp.float32)
    out3 = jax.block_until_ready(lambda_layer(x3, lam3, base=2, tile_bytes=64 << 10))
    ref3 = x3 * (jnp.float32(2.0) ** lam3[0])
    assert out3.shape == x3.shape and out3.dtype == x3.dtype
    assert jnp.allclose(out3, ref3, atol=1e-6, rtol=1e-6)

    print("KERNEL_OK")
</pallas_src>

<mosaic_0001>
module attributes {stable_mosaic.version = 11 : i64} {
  func.func @_scale_kernel(%arg0: i32, %arg1: memref<1xf32, #tpu.memory_space<smem>>, %arg2: memref<16x1024xf32, #tpu.memory_space<vmem>>, %arg3: memref<16x1024xf32, #tpu.memory_space<vmem>>) attributes {dimension_semantics = [#tpu.dimension_semantics<parallel>], iteration_bounds = array<i64: 2>, scalar_prefetch = 1 : i64, scratch_operands = 0 : i64, tpu.core_type = #tpu.core_type<tc>, window_params = [{transform_indices = @transform_0, window_bounds = array<i64: 16, 1024>}, {transform_indices = @transform_1, window_bounds = array<i64: 16, 1024>}]} {
    %c0 = arith.constant 0 : index
    %c0_0 = arith.constant 0 : index
    %0 = vector.load %arg2[%c0, %c0_0] : memref<16x1024xf32, #tpu.memory_space<vmem>>, vector<16x1024xf32>
    %c0_1 = arith.constant 0 : index
    %1 = memref.load %arg1[%c0_1] : memref<1xf32, #tpu.memory_space<smem>>
    %2 = vector.broadcast %1 : f32 to vector<16x1024xf32>
    %3 = arith.mulf %0, %2 : vector<16x1024xf32>
    %c0_2 = arith.constant 0 : index
    %c0_3 = arith.constant 0 : index
    %4 = vector.load %arg3[%c0_2, %c0_3] : memref<16x1024xf32, #tpu.memory_space<vmem>>, vector<16x1024xf32>
    tpu.vector_store %arg3[%c0_2, %c0_3], %3 {strides = array<i32>} : memref<16x1024xf32, #tpu.memory_space<vmem>>, vector<16x1024xf32>,
    return
  }
  func.func @transform_0(%arg0: i32, %arg1: memref<1xf32, #tpu.memory_space<smem>>) -> (i32, i32) {
    %c0_i32 = arith.constant 0 : i32
    %c0_i32_0 = arith.constant 0 : i32
    return %arg0, %c0_i32 : i32, i32
  }
  func.func @transform_1(%arg0: i32, %arg1: memref<1xf32, #tpu.memory_space<smem>>) -> (i32, i32) {
    %c0_i32 = arith.constant 0 : i32
    %c0_i32_0 = arith.constant 0 : i32
    return %arg0, %c0_i32 : i32, i32
  }
}

</mosaic_0001>

<bundles_post_ra>
// kernel: tpu_custom_call.1
= control target key start
LH: loop header
LB: loop body
LE: loop exit
PB: predicated region body
PF: predicated region fallthrough
CT: control target
= control target key end

     0   :  { %s669_s0 = inlined_call_operand.<no memory space> [shape: f32[1], index: 0, kind: input, shape index: {}]   ;;  %s670_s1 = inlined_call_operand.hbm [shape: f32[32,1024], index: 1, kind: input, shape index: {}]   ;;  %s671_s2 = inlined_call_operand.hbm [shape: f32[32,1024], index: 2, kind: output, shape index: {}]  }
   0x1   :  { %7 = sst [smem:[#allocation3]] %s669_s0 }
   0x2   :  { %8 = vsyncpa [#allocation5], 0 }
   0x3   :  { %10 = vsyncpa [#allocation5 + $0x1], 0 }
   0x4   :  { %11 = vsyncpa [#allocation6], 0 }
   0x5   :  { %13 = vsyncpa [#allocation6 + $0x1], 0  ;;  %s470_s11 = smov 0   ;;  %s472_s12 = smov 0  }
   0x6   :  { %s474_s13 = smov 0   ;;  %s476_s14 = smov 0  }
   0x7 LB: > { %s491_s0 = sadd.s32 4294967295, %s444_s14   ;;  %s278_s15 = sadd.s32 4294967294, %s444_s14   ;;  %s444_s14 = sphi %s476_s14, %s684_s14   ;;  %s440_s13 = sphi %s474_s13, %s683_s13   ;;  %s436_s12 = sphi %s472_s12, %s682_s12   ;;  %s432_s11 = sphi %s470_s11, %s681_s11  }
   0x8   : > { %s495_s16 = sadd.s32 1, %s444_s14   ;;  %s26_s17 = sadd.s32 1, %s440_s13 }
   0x9   : > { %s23_s18 = ssub.s32 %s444_s14, %s495_s16  ;;  %p33_p0 = scmp.ne.s32.totalorder %s440_s13, %s436_s12 }
   0xa   : > { %p24_p1 = scmp.eq.s32.totalorder %s23_s18, 0  ;;  %p34_p2 = scmp.eq.s32.totalorder %s444_s14, 0 }
   0xb   : > { %p39_p3 = scmp.ne.s32.totalorder %s436_s12, %s432_s11  ;;  %p40_p4 = scmp.eq.s32.totalorder %s491_s0, 0 }
   0xc   : > { %s507_s19 = scalar_select %p24_p1, %s440_s13, %s26_s17  }
   0xd   : > { %p509_p5 = por %p34_p2, %p33_p0  ;;  %p513_p6 = por %p40_p4, %p39_p3 }
   0xe   : > { %p63_p7 = scmp.eq.s32.totalorder %s491_s0, 1  ;;  %p69_p8 = scmp.eq.s32.totalorder %s278_s15, 1 }
   0xf   : > { %p310_p10 = scmp.lt.s32.totalorder %s444_s14, 2  ;;  %s89_s24 = sand.u32 1, %s440_s13  }
  0x10   : > { %p520_p11 = por %p63_p7, %p33_p0  ;;  %p524_p12 = por %p69_p8, %p39_p3 }
  0x11   : > { %s295_s25 = sshll.u32 %s444_s14, 11  ;;  %s281_s26 = sshll.u32 %s89_s24, 7 }
  0x12   : > { %s675_s22 = scalar_select %p520_p11, 1, 0 }
  0x13   : > { %s676_s23 = scalar_select %p524_p12, 1, 0 }
  0x14   : > { %s533_s29 = scalar_lea.hbm %s670_s1, %s295_s25  ;;  %s93_s30 = scalar_lea.vmem [#allocation4], %s281_s26 }
  0x15   : > { %s101_s3 = sshll.u32 %s93_s30, 4  ;;  %p537_p13 = pnand %p310_p10, %p509_p5  ;;  %s541_s3 = int_to_ptr.vmem [resolvable:$true] %s101_s3 }
  0x16   : > { %s543_s5 = scalar_lea.sflag [#allocation5], %s89_s24  ;;  %s348_s6 = scalar_lea.hbm %s533_s29, 2048 }
  0x17   : > { %p349_p0 = scmp.ne.s32.totalorder %s533_s29, %s348_s6  ;;  %p350_p1 = pneg %p537_p13 }
  0x18   : > { %s353_s9 = scalar_lea.hbm %s670_s1, 4096  ;;  %p354_p4 = scmp.lt.u32.totalorder %s533_s29, %s670_s1 }
  0x19   : > { %p351_p2 = pnand %p350_p1, %p349_p0  ;;  %p355_p5 = scmp.lt.u32.totalorder %s353_s9, %s348_s6 }
  0x1a   : > { %p357_p8 = scmp.lt.u32.totalorder %s348_s6, %s533_s29 }
  0x1b   : > { %p352_p3 = pneg %p351_p2  ;;  %p356_p7 = por %p355_p5, %p354_p4 }
  0x1d   : > { %p358_p10 = por %p357_p8, %p356_p7 }
  0x1f   : > { %p359_p9 = pnand %p358_p10, %p352_p3 }
  0x21   : > { %362 = shalt.err (!%p359_p9)
}
  0x22   : > { %s363_s17 = scalar_lea.vmem %s541_s3, 2048  ;;  %s446_s18 = smov [#allocation4]  }
  0x23   : > { %p364_p0 = scmp.ne.s32.totalorder %s541_s3, %s363_s17  ;;  %s368_s20 = sshll.u32 %s446_s18, 4  ;;  %s369_s20 = int_to_ptr.vmem [resolvable:$false] %s368_s20 }
  0x24   : > { %s370_s24 = scalar_lea.vmem %s369_s20, 4096  ;;  %p371_p11 = scmp.lt.s32.totalorder %s541_s3, %s369_s20 }
  0x25   : > { %p366_p2 = pnand %p364_p0, %p350_p1  ;;  %p372_p4 = scmp.lt.s32.totalorder %s370_s24, %s363_s17 }
  0x27   : > { %p367_p12 = pneg %p366_p2  ;;  %p373_p5 = por %p372_p4, %p371_p11 }
  0x29   : > { %p374_p7 = pnand %p373_p5, %p367_p12 }
  0x2b   : > { %377 = shalt.err (!%p374_p7)
}
  0x2c   : > { %s447_s25 = smov 1024   ;;  %s448_s26 = smov 64  }
  0x2d   : > { %305 = dma.hbm_to_vmem [thread:$0]  (!%p537_p13), %s533_s29, 2048, %s541_s3, %s543_s5, %s447_s25, %s447_s25, %s448_s26  }
  0x2e   : > { %p285_p9 = scmp.ge.s32.totalorder %s444_s14, 1  ;;  %p109_p1 = scmp.lt.s32.totalorder %s444_s14, 3 }
  0x30   : > { %p110_p3 = pnand %p285_p9, %p109_p1 }
  0x31   : > { %s574_s27 = sand.u32 (!%p110_p3), 1, %s436_s12  }
  0x32   : > { %113 = sbr.rel (%p110_p3) target bundleno = 89 (0x59), region = 24  ;;  %s286_s28 = sshll.u32 (!%p110_p3), %s574_s27, 7 }
  0x33   : > { %s116_s30 = scalar_lea.sflag (!%p110_p3), [#allocation5], %s574_s27  ;;  %s578_s6 = scalar_lea.vmem (!%p110_p3), [#allocation4], %s286_s28 }
  0x39   : > { %423 = dma.done.wait (%p513_p6), %s116_s30, 2048  }
  0x3a   : > { %425 = vsyncadd (%p513_p6), %s116_s30, 4294965248  ;;  %s156_s29 = sld [smem:[#allocation3]]  ;;  %v140_v0 = vld [vmem:[%s578_s6] sm:$0xff]  ;;  %v141_v2 = vld [vmem:[%s578_s6 + $0x8] sm:$0xff]  ;;  %s297_s21 = sshll.u32 %s491_s0, 11 }
  0x3b   : > { %v142_v3 = vld [vmem:[%s578_s6 + $0x10] sm:$0xff]  ;;  %v143_v7 = vld [vmem:[%s578_s6 + $0x18] sm:$0xff]  ;;  %v144_v8 = vld [vmem:[%s578_s6 + $0x20] sm:$0xff]  ;;  %s594_s3 = scalar_lea.vmem [#allocation7], %s286_s28  ;;  %s616_s7 = scalar_lea.hbm %s671_s2, %s297_s21 }
  0x3c   : > { %v145_v9 = vld [vmem:[%s578_s6 + $0x28] sm:$0xff]  ;;  %v146_v13 = vld [vmem:[%s578_s6 + $0x30] sm:$0xff]  ;;  %v147_v14 = vld [vmem:[%s578_s6 + $0x38] sm:$0xff]  ;;  %s205_s4 = sshll.u32 %s594_s3, 4  ;;  %s191_s8 = scalar_lea.sflag [#allocation6], %s574_s27  ;;  %s618_s4 = int_to_ptr.vmem [resolvable:$true] %s205_s4 }
  0x3d   : > { %v148_v15 = vld [vmem:[%s578_s6 + $0x40] sm:$0xff]  ;;  %v149_v19 = vld [vmem:[%s578_s6 + $0x48] sm:$0xff]  ;;  %v150_v20 = vld [vmem:[%s578_s6 + $0x50] sm:$0xff]  ;;  %s378_s9 = scalar_lea.vmem %s618_s4, 2048  ;;  %p678_p11 = scmp.ne.s32.totalorder %s675_s22, 0 }
  0x3e   : > { %v151_v21 = vld [vmem:[%s578_s6 + $0x58] sm:$0xff]  ;;  %v152_v25 = vld [vmem:[%s578_s6 + $0x60] sm:$0xff]  ;;  %v153_v26 = vld [vmem:[%s578_s6 + $0x68] sm:$0xff]  ;;  %p379_p6 = scmp.ne.s32.totalorder %s618_s4, %s378_s9  ;;  %s449_s10 = smov [#allocation7]  }
  0x3f   : > { %v154_v27 = vld [vmem:[%s578_s6 + $0x70] sm:$0xff]  ;;  %v155_v31 = vld [vmem:[%s578_s6 + $0x78] sm:$0xff]  ;;  %s382_s15 = sshll.u32 %s449_s10, 4  ;;  %s383_s15 = int_to_ptr.vmem [resolvable:$false] %s382_s15 }
  0x40   : > { %v157_v1 = vstv %s156_s29  ;;  %p380_p12 = pnand %p379_p6, %p678_p11  ;;  %s384_s17 = scalar_lea.vmem %s383_s15, 4096 }
  0x41   : > { %v158_v4 = vmul.f32 %v157_v1, %v140_v0  ;;  %v159_v5 = vmul.f32 %v157_v1, %v141_v2  ;;  %v160_v6 = vmul.f32 %v157_v1, %v142_v3  ;;  %v161_v10 = vmul.f32 %v157_v1, %v143_v7  ;;  %p385_p8 = scmp.lt.s32.totalorder %s618_s4, %s383_s15  ;;  %p386_p10 = scmp.lt.s32.totalorder %s384_s17, %s378_s9 }
  0x42   : > { %v162_v11 = vmul.f32 %v157_v1, %v144_v8  ;;  %v163_v12 = vmul.f32 %v157_v1, %v145_v9  ;;  %v164_v16 = vmul.f32 %v157_v1, %v146_v13  ;;  %v165_v17 = vmul.f32 %v157_v1, %v147_v14  ;;  %p381_p13 = pneg %p380_p12 }
  0x43   : > { %174 = vst [vmem:[%s594_s3] sm:$0xff] %v158_v4  ;;  %175 = vst [vmem:[%s594_s3 + $0x8] sm:$0xff] %v159_v5  ;;  %v166_v18 = vmul.f32 %v157_v1, %v148_v15  ;;  %v167_v22 = vmul.f32 %v157_v1, %v149_v19  ;;  %v168_v23 = vmul.f32 %v157_v1, %v150_v20  ;;  %p387_p0 = por %p386_p10, %p385_p8 }
  0x44   : > { %176 = vst [vmem:[%s594_s3 + $0x10] sm:$0xff] %v160_v6  ;;  %177 = vst [vmem:[%s594_s3 + $0x18] sm:$0xff] %v161_v10  ;;  %v169_v24 = vmul.f32 %v157_v1, %v151_v21  ;;  %v170_v28 = vmul.f32 %v157_v1, %v152_v25  ;;  %v171_v29 = vmul.f32 %v157_v1, %v153_v26 }
  0x45   : > { %178 = vst [vmem:[%s594_s3 + $0x20] sm:$0xff] %v162_v11  ;;  %179 = vst [vmem:[%s594_s3 + $0x28] sm:$0xff] %v163_v12  ;;  %v172_v30 = vmul.f32 %v157_v1, %v154_v27  ;;  %v173_v32 = vmul.f32 %v157_v1, %v155_v31  ;;  %p388_p2 = pnand %p387_p0, %p381_p13 }
  0x46   : > { %180 = vst [vmem:[%s594_s3 + $0x30] sm:$0xff] %v164_v16  ;;  %181 = vst [vmem:[%s594_s3 + $0x38] sm:$0xff] %v165_v17 }
  0x47   : > { %182 = vst [vmem:[%s594_s3 + $0x40] sm:$0xff] %v166_v18  ;;  %183 = vst [vmem:[%s594_s3 + $0x48] sm:$0xff] %v167_v22 }
  0x48   : > { %184 = vst [vmem:[%s594_s3 + $0x50] sm:$0xff] %v168_v23  ;;  %185 = vst [vmem:[%s594_s3 + $0x58] sm:$0xff] %v169_v24 }
  0x49   : > { %186 = vst [vmem:[%s594_s3 + $0x60] sm:$0xff] %v170_v28  ;;  %187 = vst [vmem:[%s594_s3 + $0x68] sm:$0xff] %v171_v29 }
  0x4a   : > { %188 = vst [vmem:[%s594_s3 + $0x70] sm:$0xff] %v172_v30  ;;  %189 = vst [vmem:[%s594_s3 + $0x78] sm:$0xff] %v173_v32 }
  0x4b   : > { %391 = shalt.err (!%p388_p2)
}
  0x4c   : > { %s392_s18 = scalar_lea.hbm %s616_s7, 2048  ;;  %s396_s25 = scalar_lea.hbm %s671_s2, 4096 }
  0x4d   : > { %p393_p4 = scmp.ne.s32.totalorder %s616_s7, %s392_s18  ;;  %p397_p9 = scmp.lt.u32.totalorder %s616_s7, %s671_s2 }
  0x4e   : > { %p398_p1 = scmp.lt.u32.totalorder %s396_s25, %s392_s18  ;;  %p400_p6 = scmp.lt.u32.totalorder %s392_s18, %s616_s7 }
  0x4f   : > { %p394_p5 = pnand %p393_p4, %p678_p11 }
  0x50   : > { %p399_p3 = por %p398_p1, %p397_p9 }
  0x51   : > { %p395_p7 = pneg %p394_p5 }
  0x52   : > { %p401_p12 = por %p400_p6, %p399_p3 }
  0x54   : > { %p402_p13 = pnand %p401_p12, %p395_p7 }
  0x56   : > { %405 = shalt.err (!%p402_p13)
}
  0x57   : > { %s450_s30 = smov 1024   ;;  %s451_s6 = smov 64  }
  0x58   : > { %300 = dma.vmem_to_hbm [thread:$0]  (%p678_p11), %s618_s4, 2048, %s616_s7, %s191_s8, %s450_s30, %s450_s30, %s451_s6  }
  0x59 PF: > { %s220_s29 = sand.u32 1, %s432_s11   ;;  %p679_p8 = scmp.ne.s32.totalorder %s676_s23, 0 }
  0x5a   : > { %p680_p10 = scmp.ge.s32.totalorder %s444_s14, 2  ;;  %s221_s21 = scalar_lea.sflag [#allocation6], %s220_s29 }
  0x5c   : > { %p307_p0 = pnand %p680_p10, %p679_p8 }
  0x5e   : > { %427 = dma.done.wait (!%p307_p0), %s221_s21, 2048  }
  0x5f   : > { %429 = vsyncadd (!%p307_p0), %s221_s21, 4294965248  ;;  %p16_p2 = scmp.ge.s32.totalorder %s495_s16, 4   ;;  %s681_s11 = smov %s436_s12 }
  0x60   : > { %s682_s12 = smov %s440_s13  ;;  %s683_s13 = smov %s507_s19 }
  0x61   : > { %s684_s14 = smov %s495_s16  ;;  %18 = sbr.rel (!%p16_p2) target bundleno = 7 (0x7), region = 69 }
  0x68   :  { %226 = vsyncpa [#allocation5], 1 }
  0x69   :  { %228 = vsyncpa [#allocation5 + $0x1], 1 }
  0x6a   :  { %229 = vsyncpa [#allocation6], 1 }
  0x6b   :  { %231 = vsyncpa [#allocation6 + $0x1], 1 }

</bundles_post_ra>
